<compile_context>
chip_gen: v7x
topology: tpu7x:2x2x1
jax: 0.10.0
libtpu: 0.0.40
codegen_flags: <defaults>
</compile_context>

<pallas_src>
import functools

import jax
import jax.numpy as jnp
import numpy as np
from jax import lax
from jax.experimental import pallas as pl
from jax.experimental.pallas import tpu as pltpu

KERNEL_SIZE = 25  # TimesNet default moving_avg window (odd, stride=1)


def _series_decomp_kernel(x_ref, res_ref, mean_ref, *, chan, kernel_size):
    # Block: (rows, N) with N = L*C flattened (lane-dense).
    rows, n = x_ref.shape
    pad = (kernel_size - 1) // 2

    # Widen once; for f32 inputs this is a no-op, for bf16 it removes the
    # 2*pad per-iteration casts (v5e has no native bf16 VPU).
    # TODO(synk): on v6e/v7x a bf16-native roll/select chain would halve the
    # vregs through the XLU/vst; branch on chip generation if bf16 matters.
    xf = x_ref[...].astype(jnp.float32)

    # Loop-invariant boundary masks at (1, n); jnp.where broadcasts them
    # against the (rows, n) data.
    lane = lax.broadcasted_iota(jnp.int32, (1, n), dimension=1)
    first_row = lane < chan          # flat lane positions of time step 0
    last_row = lane >= n - chan      # flat lane positions of time step L-1

    # Replicate-padded moving sum via iterated clamped shifts (XLU rolls):
    #   fwd_j[t] = x[min(t+j, L-1)]  -> roll lanes by +C (time +1), keep last row
    #   bwd_j[t] = x[max(t-j, 0)]    -> roll lanes by -C (time -1), keep first row
    #   acc = sum_{j=-pad..pad} x[clip(t+j, 0, L-1)]
    fwd = xf
    bwd = xf
    acc = xf
    for _ in range(pad):
        fwd = jnp.where(last_row, fwd, pltpu.roll(fwd, shift=n - chan, axis=1))
        bwd = jnp.where(first_row, bwd, pltpu.roll(bwd, shift=chan, axis=1))
        acc = acc + (fwd + bwd)

    mean = acc * (1.0 / kernel_size)
    mean_ref[...] = mean.astype(mean_ref.dtype)
    res_ref[...] = (xf - mean).astype(res_ref.dtype)


def _block_plan(B, N, itemsize):
    """Pick the batch-row block size and the VMEM limit to request."""
    # Native sublane tile for the dtype (packing): f32 -> 8, bf16 -> 16, 1B -> 32.
    sub = max(8, 32 // itemsize)

    # True per-row footprint: double-buffered pipeline blocks for
    # (1 input + 2 outputs) at the I/O dtype, plus ~6 live full-block f32
    # temporaries inside the kernel (xf, fwd, bwd, acc, mean, res).
    per_row = N * (2 * 3 * itemsize + 6 * 4)

    try:
        vmem_phys = int(pltpu.get_tpu_info().vmem_capacity_bytes)
    except Exception:  # no TPU info available -> be v7x-conservative
        vmem_phys = 64 * 1024 * 1024
    budget = int(vmem_phys * 0.55)
    rows_budget = max(1, budget // per_row)

    total_bytes = B * N * itemsize
    if B >= 4 * sub and total_bytes > (1 << 20):
        min_steps = 4          # big payload: keep the pipeline busy
    elif B > sub:
        min_steps = 2          # at least 2 grid steps / both v7x cores
    else:
        min_steps = 1          # small batch: single full-dim block (legal)

    if min_steps == 1:
        rows = B
    else:
        rows = min(rows_budget, B // min_steps)
        if rows < sub:
            # Cannot go below one sublane tile without violating the (8,128)
            # block constraint; size the VMEM request from the true footprint
            # instead of silently overshooting a fixed limit.
            rows = sub
        else:
            rows = (rows // sub) * sub
        rows = min(rows, B)

    needed = rows * per_row + (2 << 20)           # + slack for masks/metadata
    vmem_limit = int(min(vmem_phys * 0.9, max(needed, 32 << 20)))
    return rows, vmem_limit


def series_decomp(x, kernel_size=KERNEL_SIZE):
    """x: [B, L, C] -> (res, moving_mean), each [B, L, C]."""
    if kernel_size < 1 or kernel_size % 2 != 1:
        raise ValueError("kernel_size must be odd (TimesNet configs) so the "
                         "output length equals the input length.")
    B, L, C = x.shape
    N = L * C

    # Free reshape (contiguous trailing dims) -> lane-dense [B, N] layout.
    x2 = x.reshape(B, N)
    itemsize = jnp.dtype(x.dtype).itemsize
    rows, vmem_limit = _block_plan(B, N, itemsize)
    grid = (pl.cdiv(B, rows),)

    kernel = functools.partial(
        _series_decomp_kernel, chan=C, kernel_size=kernel_size)

    res2, mean2 = pl.pallas_call(
        kernel,
        out_shape=(
            jax.ShapeDtypeStruct((B, N), x.dtype),
            jax.ShapeDtypeStruct((B, N), x.dtype),
        ),
        grid_spec=pltpu.PrefetchScalarGridSpec(
            num_scalar_prefetch=0,
            grid=grid,
            in_specs=[pl.BlockSpec((rows, N), lambda b: (b, 0))],
            out_specs=(
                pl.BlockSpec((rows, N), lambda b: (b, 0)),
                pl.BlockSpec((rows, N), lambda b: (b, 0)),
            ),
        ),
        compiler_params=pltpu.CompilerParams(
            dimension_semantics=("parallel",),
            vmem_limit_bytes=vmem_limit,
        ),
    )(x2)
    return res2.reshape(B, L, C), mean2.reshape(B, L, C)


def _reference(x, kernel_size):
    # Pure-JAX reference mirroring the PyTorch forward (replicate pad + avgpool).
    pad = (kernel_size - 1) // 2
    front = jnp.repeat(x[:, 0:1, :], pad, axis=1)
    end = jnp.repeat(x[:, -1:, :], pad, axis=1)
    xp = jnp.concatenate([front, x, end], axis=1)          # (B, L+2p, C)
    L = x.shape[1]
    mean = sum(xp[:, j:j + L, :] for j in range(kernel_size)) / kernel_size
    return x - mean, mean


def _check(x, kernel_size, atol, ref_dtype=None):
    res, mean = series_decomp(x, kernel_size)
    jax.block_until_ready((res, mean))
    xr = x.astype(ref_dtype) if ref_dtype is not None else x
    ref_res, ref_mean = _reference(xr, kernel_size)
    ok = np.allclose(np.asarray(res, dtype=np.float32),
                     np.asarray(ref_res, dtype=np.float32), atol=atol)
    ok &= np.allclose(np.asarray(mean, dtype=np.float32),
                      np.asarray(ref_mean, dtype=np.float32), atol=atol)
    return bool(ok)


if __name__ == "__main__":
    key = jax.random.PRNGKey(0)
    k1, k2, k3, k4, k5 = jax.random.split(key, 5)

    # 1) Small single-block case (B <= sublane tile -> one (B, L*C) block).
    x_a = jax.random.normal(k1, (2, 32, 8), dtype=jnp.float32)
    assert _check(x_a, 5, atol=1e-5)

    # 2) Multi-block case: batch tiled into 2 parallel grid steps, C not a
    #    power of 2, N = L*C not a multiple of 128.
    x_b = jax.random.normal(k2, (16, 48, 7), dtype=jnp.float32)
    assert _check(x_b, 7, atol=1e-5)

    # 3) Ragged last block: B=20 with rows=8 -> blocks of 8, 8, 4.
    x_c = jax.random.normal(k3, (20, 40, 6), dtype=jnp.float32)
    assert _check(x_c, 5, atol=1e-5)

    # 4) TimesNet default window (kernel_size=25, pad=12).
    x_d = jax.random.normal(k4, (16, 36, 7), dtype=jnp.float32)
    assert _check(x_d, 25, atol=1e-5)

    # 5) bf16 input: widened once to f32 inside the kernel.
    x_e = jax.random.normal(k5, (16, 48, 7), dtype=jnp.bfloat16)
    assert _check(x_e, 7, atol=5e-2, ref_dtype=jnp.float32)

    print("KERNEL_OK")
</pallas_src>

<mosaic_0001>
module attributes {stable_mosaic.version = 11 : i64} {
  func.func @_series_decomp_kernel(%arg0: i32, %arg1: memref<2x256xf32, #tpu.memory_space<vmem>>, %arg2: memref<2x256xf32, #tpu.memory_space<vmem>>, %arg3: memref<2x256xf32, #tpu.memory_space<vmem>>) attributes {dimension_semantics = [#tpu.dimension_semantics<parallel>], iteration_bounds = array<i64: 1>, scalar_prefetch = 0 : i64, scratch_operands = 0 : i64, tpu.core_type = #tpu.core_type<tc>, window_params = [{transform_indices = @transform_0, window_bounds = array<i64: 2, 256>}, {transform_indices = @transform_1, window_bounds = array<i64: 2, 256>}, {transform_indices = @transform_2, window_bounds = array<i64: 2, 256>}]} {
    %c0 = arith.constant 0 : index
    %c0_0 = arith.constant 0 : index
    %0 = vector.load %arg1[%c0, %c0_0] : memref<2x256xf32, #tpu.memory_space<vmem>>, vector<2x256xf32>
    %1 = tpu.iota {dimensions = array<i32: 1>} : vector<1x256xi32>
    %c8_i32 = arith.constant 8 : i32
    %2 = vector.broadcast %c8_i32 : i32 to vector<1x256xi32>
    %3 = arith.cmpi slt, %1, %2 : vector<1x256xi32>
    %c248_i32 = arith.constant 248 : i32
    %4 = vector.broadcast %c248_i32 : i32 to vector<1x256xi32>
    %5 = arith.cmpi sge, %1, %4 : vector<1x256xi32>
    %c248_i32_1 = arith.constant 248 : i32
    %6 = tpu.dynamic_rotate %0 by %c248_i32_1 dim 1 : vector<2x256xf32>, i32 -> vector<2x256xf32>
    %7 = vector.shape_cast %5 : vector<1x256xi1> to vector<1x256xi1>
    %8 = vector.broadcast %7 : vector<1x256xi1> to vector<2x256xi1>
    %9 = arith.select %8, %0, %6 : vector<2x256xi1>, vector<2x256xf32>
    %c8_i32_2 = arith.constant 8 : i32
    %10 = tpu.dynamic_rotate %0 by %c8_i32_2 dim 1 : vector<2x256xf32>, i32 -> vector<2x256xf32>
    %11 = vector.shape_cast %3 : vector<1x256xi1> to vector<1x256xi1>
    %12 = vector.broadcast %11 : vector<1x256xi1> to vector<2x256xi1>
    %13 = arith.select %12, %0, %10 : vector<2x256xi1>, vector<2x256xf32>
    %14 = arith.addf %9, %13 : vector<2x256xf32>
    %15 = arith.addf %0, %14 : vector<2x256xf32>
    %c248_i32_3 = arith.constant 248 : i32
    %16 = tpu.dynamic_rotate %9 by %c248_i32_3 dim 1 : vector<2x256xf32>, i32 -> vector<2x256xf32>
    %17 = vector.shape_cast %5 : vector<1x256xi1> to vector<1x256xi1>
    %18 = vector.broadcast %17 : vector<1x256xi1> to vector<2x256xi1>
    %19 = arith.select %18, %9, %16 : vector<2x256xi1>, vector<2x256xf32>
    %c8_i32_4 = arith.constant 8 : i32
    %20 = tpu.dynamic_rotate %13 by %c8_i32_4 dim 1 : vector<2x256xf32>, i32 -> vector<2x256xf32>
    %21 = vector.shape_cast %3 : vector<1x256xi1> to vector<1x256xi1>
    %22 = vector.broadcast %21 : vector<1x256xi1> to vector<2x256xi1>
    %23 = arith.select %22, %13, %20 : vector<2x256xi1>, vector<2x256xf32>
    %24 = arith.addf %19, %23 : vector<2x256xf32>
    %25 = arith.addf %15, %24 : vector<2x256xf32>
    %cst = arith.constant 2.000000e-01 : f32
    %26 = vector.broadcast %cst : f32 to vector<2x256xf32>
    %27 = arith.mulf %25, %26 : vector<2x256xf32>
    %c0_5 = arith.constant 0 : index
    %c0_6 = arith.constant 0 : index
    %28 = vector.load %arg3[%c0_5, %c0_6] : memref<2x256xf32, #tpu.memory_space<vmem>>, vector<2x256xf32>
    tpu.vector_store %arg3[%c0_5, %c0_6], %27 {strides = array<i32>} : memref<2x256xf32, #tpu.memory_space<vmem>>, vector<2x256xf32>,
    %29 = arith.subf %0, %27 : vector<2x256xf32>
    %c0_7 = arith.constant 0 : index
    %c0_8 = arith.constant 0 : index
    %30 = vector.load %arg2[%c0_7, %c0_8] : memref<2x256xf32, #tpu.memory_space<vmem>>, vector<2x256xf32>
    tpu.vector_store %arg2[%c0_7, %c0_8], %29 {strides = array<i32>} : memref<2x256xf32, #tpu.memory_space<vmem>>, vector<2x256xf32>,
    return
  }
  func.func @transform_0(%arg0: i32) -> (i32, i32) {
    %c0_i32 = arith.constant 0 : i32
    %c0_i32_0 = arith.constant 0 : i32
    return %arg0, %c0_i32 : i32, i32
  }
  func.func @transform_1(%arg0: i32) -> (i32, i32) {
    %c0_i32 = arith.constant 0 : i32
    %c0_i32_0 = arith.constant 0 : i32
    return %arg0, %c0_i32 : i32, i32
  }
  func.func @transform_2(%arg0: i32) -> (i32, i32) {
    %c0_i32 = arith.constant 0 : i32
    %c0_i32_0 = arith.constant 0 : i32
    return %arg0, %c0_i32 : i32, i32
  }
}

</mosaic_0001>

<bundles_post_ra>
// kernel: tpu_custom_call.1
= control target key start
LH: loop header
LB: loop body
LE: loop exit
PB: predicated region body
PF: predicated region fallthrough
CT: control target
= control target key end

     0   :  { %8 = vsyncpa [#allocation3], 0  ;;  %s297_s0 = inlined_call_operand.hbm [shape: f32[2,256], index: 0, kind: input, shape index: {}]   ;;  %s298_s1 = inlined_call_operand.hbm [shape: f32[2,256], index: 1, kind: output, shape index: {0}]   ;;  %s299_s2 = inlined_call_operand.hbm [shape: f32[2,256], index: 2, kind: output, shape index: {1}]  }
   0x1   :  { %9 = vsyncpa [#allocation4], 0 }
   0x2   :  { %10 = vsyncpa [#allocation7], 0  ;;  %s223_s9 = smov [#allocation2]   ;;  %s151_s13 = scalar_lea.hbm %s297_s0, 64 }
   0x3   :  { %s17_s10 = sshll.u32 %s223_s9, 4  ;;  %p152_p0 = scmp.ne.s32.totalorder %s297_s0, %s151_s13  ;;  %s18_s10 = int_to_ptr.vmem [resolvable:$true] %s17_s10 }
   0x4   :  { %p155_p1 = scmp.lt.u32.totalorder %s151_s13, %s297_s0 }
   0x6   :  { %p157_p2 = pnand %p155_p1, %p152_p0 }
   0x8   :  { %160 = shalt.err (!%p157_p2)
}
   0x9   :  { %s161_s18 = scalar_lea.vmem %s18_s10, 64  ;;  %p166_p4 = scmp.lt.s32.totalorder %s18_s10, %s18_s10 }
   0xa   :  { %p162_p3 = scmp.ne.s32.totalorder %s18_s10, %s161_s18  ;;  %p167_p5 = scmp.lt.s32.totalorder %s161_s18, %s161_s18 }
   0xc   :  { %p168_p6 = por %p167_p5, %p166_p4 }
   0xe   :  { %p169_p7 = pnand %p168_p6, %p162_p3 }
  0x10   :  { %172 = shalt.err (!%p169_p7)
}
  0x11   :  { %20 = dma.hbm_to_vmem [thread:$0]  %s297_s0, 64, %s18_s10, [#allocation3]  }
  0x12   :  { %217 = dma.done.wait [#allocation3], 64  }
  0x13   :  { %218 = vsyncadd [#allocation3], 4294967232  ;;  %v25_v0 = vlaneseq  ;;  %v224_v1 = vmov 1983009808   ;;  %v256_v6 = vld [vmem:[#allocation2] sm:$0xf] }
  0x14   :  { %v34_v2 = vunpack.c.l.s4 %v224_v1  ;;  %s225_s21 = smov 8   ;;  %s226_s22 = smov 120  }
  0x15   :  { %v37_v3 = vshrl.u32 %v25_v0, 7  ;;  %v26_v9 = vand.u32 127, %v25_v0  ;;  %s227_s0 = smov [#allocation6]   ;;  %s228_s24 = smov [#allocation5]  }
  0x16   :  { %v35_v4 = vunpack.c.0.s8 %v34_v2  ;;  %s132_s23 = sshll.u32 %s227_s0, 4  ;;  %s122_s25 = sshll.u32 %s228_s24, 4  ;;  %s133_s23 = int_to_ptr.vmem [resolvable:$true] %s132_s23  ;;  %s123_s25 = int_to_ptr.vmem [resolvable:$true] %s122_s25 }
  0x17   :  { %v27_v10 = vadd.s32 128, %v26_v9  ;;  %vm28_vm0 = vcmp.lt.s32.totalorder %v26_v9, 8  ;;  %vm47_vm1 = vcmp.lt.s32.totalorder %v26_v9, 120  ;;  %s173_s26 = scalar_lea.vmem %s133_s23, 64  ;;  %p178_p9 = scmp.lt.s32.totalorder %s133_s23, %s133_s23 }
  0x18   :  { %v38_v5 = vsub.s32 %v35_v4, %v37_v3  ;;  %p174_p8 = scmp.ne.s32.totalorder %s133_s23, %s173_s26  ;;  %p179_p10 = scmp.lt.s32.totalorder %s173_s26, %s173_s26 }
  0x19   :  { %vm31_vm2 = vcmp.ge.s32.totalorder %v27_v10, 248 }
  0x1a   :  { %v39_v7 = vrot.slane %v256_v6, %v38_v5  ;;  %p180_p11 = por %p179_p10, %p178_p9 }
  0x1c   :  { %56 = vrot.lane.b32.xlu1 %v39_v7, %s225_s21  ;;  %43 = vrot.lane.b32.xlu0 %v39_v7, %s226_s22  ;;  %v40_v8 = vcombine.high %v39_v7, %v39_v7  ;;  %p181_p12 = pnand %p180_p11, %p174_p8 }
  0x20   :  { %58 = vrot.lane.b32.xlu1 %v40_v8, %s225_s21  ;;  %45 = vrot.lane.b32.xlu0 %v40_v8, %s226_s22 }
  0x8e   :  { %v57_v11 = vpop.permute.xlu1 %56  ;;  %v44_v12 = vpop.permute.xlu0 %43 }
  0x92   :  { %v59_v13 = vpop.permute.xlu1 %58  ;;  %v46_v14 = vpop.permute.xlu0 %45 }
  0x93   :  { %v61_v15 = vsel %vm28_vm0, %v59_v13, %v57_v11  ;;  %v49_v16 = vsel %vm47_vm1, %v46_v14, %v44_v12  ;;  %v48_v17 = vsel %vm47_vm1, %v44_v12, %v46_v14  ;;  %v60_v18 = vsel %vm28_vm0, %v57_v11, %v59_v13 }
  0x94   :  { %82 = vrot.lane.b32.xlu0 %v48_v17, %s226_s22  ;;  %v55_v19 = vsel %vm31_vm2, %v40_v8, %v49_v16  ;;  %v66_v20 = vsel %vm28_vm0, %v39_v7, %v61_v15 }
  0x95   :  { %84 = vrot.lane.b32.xlu1 %v55_v19, %s226_s22  ;;  %v68_v21 = vadd.f32 %v66_v20, %v48_v17  ;;  %v69_v22 = vadd.f32 %v60_v18, %v55_v19 }
  0x97   :  { %v72_v23 = vcombine.low %v68_v21, %v69_v22 }
  0x98   :  { %90 = vrot.lane.b32.xlu0 %v66_v20, %s225_s21 }
  0x99   :  { %92 = vrot.lane.b32.xlu1 %v60_v18, %s225_s21  ;;  %v79_v35 = vrot.slane %v72_v23, %v38_v5 }
  0x9b   :  { %v81_v39 = vadd.f32 %v79_v35, %v256_v6 }
 0x106   :  { %v83_v24 = vpop.permute.xlu0 %82 }
 0x107   :  { %v85_v25 = vpop.permute.xlu1 %84 }
 0x108   :  { %v87_v26 = vsel %vm47_vm1, %v85_v25, %v83_v24  ;;  %v86_v32 = vsel %vm47_vm1, %v83_v24, %v85_v25 }
 0x109   :  { %v89_v29 = vsel %vm31_vm2, %v40_v8, %v87_v26 }
 0x10a   :  { %v91_v27 = vpop.permute.xlu0 %90 }
 0x10b   :  { %v93_v28 = vpop.permute.xlu1 %92 }
 0x10c   :  { %v94_v30 = vsel %vm28_vm0, %v91_v27, %v93_v28  ;;  %v95_v31 = vsel %vm28_vm0, %v93_v28, %v91_v27 }
 0x10d   :  { %v96_v33 = vsel %vm28_vm0, %v39_v7, %v95_v31  ;;  %v99_v34 = vadd.f32 %v94_v30, %v89_v29 }
 0x10e   :  { %v98_v36 = vadd.f32 %v96_v33, %v86_v32 }
 0x110   :  { %v102_v37 = vcombine.low %v98_v36, %v99_v34 }
 0x112   :  { %v109_v38 = vrot.slane %v102_v37, %v38_v5 }
 0x114   :  { %v111_v40 = vadd.f32 %v109_v38, %v81_v39 }
 0x116   :  { %v112_v41 = vmul.f32 0.2, %v111_v40 }
 0x118   :  { %v114_v42 = vsub.f32 %v256_v6, %v112_v41  ;;  %113 = vst [vmem:[#allocation6] sm:$0xf] %v112_v41 }
 0x119   :  { %184 = shalt.err (!%p181_p12)
}
 0x11a   :  { %s185_s29 = scalar_lea.hbm %s299_s2, 64 }
 0x11b   :  { %p186_p13 = scmp.ne.s32.totalorder %s299_s2, %s185_s29  ;;  %p189_p0 = scmp.lt.u32.totalorder %s185_s29, %s299_s2 }
 0x11d   :  { %p191_p1 = pnand %p189_p0, %p186_p13 }
 0x11f   :  { %194 = shalt.err (!%p191_p1)
}
 0x120   :  { %135 = dma.vmem_to_hbm [thread:$0]  %s133_s23, 64, %s299_s2, [#allocation7]   ;;  %115 = vst [vmem:[#allocation5] sm:$0xf] %v114_v42 }
 0x121   :  { %s195_s8 = scalar_lea.vmem %s123_s25, 64  ;;  %p200_p3 = scmp.lt.s32.totalorder %s123_s25, %s123_s25 }
 0x122   :  { %p196_p2 = scmp.ne.s32.totalorder %s123_s25, %s195_s8  ;;  %p201_p4 = scmp.lt.s32.totalorder %s195_s8, %s195_s8 }
 0x124   :  { %p202_p5 = por %p201_p4, %p200_p3 }
 0x126   :  { %p203_p6 = pnand %p202_p5, %p196_p2 }
 0x128   :  { %206 = shalt.err (!%p203_p6)
}
 0x129   :  { %s207_s11 = scalar_lea.hbm %s298_s1, 64 }
 0x12a   :  { %p208_p7 = scmp.ne.s32.totalorder %s298_s1, %s207_s11  ;;  %p211_p8 = scmp.lt.u32.totalorder %s207_s11, %s298_s1 }
 0x12c   :  { %p213_p9 = pnand %p211_p8, %p208_p7 }
 0x12e   :  { %216 = shalt.err (!%p213_p9)
}
 0x12f   :  { %125 = dma.vmem_to_hbm [thread:$0]  %s123_s25, 64, %s298_s1, [#allocation4]  }
 0x130   :  { %219 = dma.done.wait [#allocation4], 64  }
 0x131   :  { %220 = vsyncadd [#allocation4], 4294967232 }
 0x132   :  { %221 = dma.done.wait [#allocation7], 64  }
 0x133   :  { %222 = vsyncadd [#allocation7], 4294967232 }
 0x134   :  { %142 = vsyncpa [#allocation3], 1 }
 0x135   :  { %143 = vsyncpa [#allocation4], 1 }
 0x136   :  { %144 = vsyncpa [#allocation7], 1 }

</bundles_post_ra>
